<compile_context>
chip_gen: v6e
topology: v6e:2x2x1
jax: 0.10.0
libtpu: 0.0.40
codegen_flags: <defaults>
</compile_context>

<pallas_src>
import functools

import jax
import jax.numpy as jnp
from jax.experimental import pallas as pl
from jax.experimental.pallas import tpu as pltpu


def _dot_product_attention_kernel(q_ref, k_ref, v_ref, m_ref, o_ref, *, scale):
    # Per-grid-step refs (Bt batch rows per step):
    #   q_ref: (Bt, Dk)   k_ref: (Bt, P, Dk)   v_ref: (Bt, P, Dv)
    #   m_ref: (Bt, P)    o_ref: (Bt, Dv)
    q = q_ref[...].astype(jnp.float32)                     # (Bt, Dk)
    k = k_ref[...].astype(jnp.float32)                     # (Bt, P, Dk)
    m = m_ref[...].astype(jnp.float32)                     # (Bt, P)

    # energy[b, p] = sum_d q[b, d] * k[b, p, d]  (VPU multiply + lane reduce over Dk)
    energy = jnp.sum(q[:, None, :] * k, axis=-1)           # (Bt, P)
    # Multiplicative mask BEFORE scaling (matches the PyTorch module exactly).
    s = energy * m * scale

    # Numerically-stable softmax over P.
    s = s - jnp.max(s, axis=-1, keepdims=True)
    p = jnp.exp(s)
    p = p * pl.reciprocal(jnp.sum(p, axis=-1, keepdims=True), approx=True)

    # out[b, v] = sum_p attn[b, p] * V[b, p, v]  (broadcast-multiply + sublane reduce)
    v = v_ref[...].astype(jnp.float32)                     # (Bt, P, Dv)
    out = jnp.sum(p[:, :, None] * v, axis=1)               # (Bt, Dv)
    o_ref[...] = out.astype(o_ref.dtype)


def dot_product_attention(Q, K, V, mask=None, *, max_batch_tile=128):
    """Pallas TPU implementation of DotProductAttention.forward.

    Args:
      Q:    [B, Dk]
      K:    [B, Dk, P]
      V:    [B, Dv, P]
      mask: optional [B, P]
    Returns:
      [B, Dv]
    """
    B, Dk = Q.shape
    _, _, P = K.shape
    _, Dv, _ = V.shape
    scale = 1.0 / (Dk ** 0.5)

    if mask is None:
        mask = jnp.ones((B, P), dtype=Q.dtype)

    # One-time wrapper transposes (layout plumbing): put Dk/Dv on the lane axis
    # and remove the per-step in-kernel transpose.
    Kt = jnp.transpose(K, (0, 2, 1))   # [B, P, Dk]
    Vt = jnp.transpose(V, (0, 2, 1))   # [B, P, Dv]

    # Batch tile Bt: many rows per grid step. Cap so double-buffered blocks stay
    # comfortably inside VMEM on every generation (v7x has 64 MiB physical).
    def _blk_bytes(bt):
        # conservative: count everything at 4 B/elem (f32 compute upcast)
        return (bt * Dk + bt * P * Dk + bt * P * Dv + bt * P + bt * Dv) * 4

    Bt = B if B <= max_batch_tile else max_batch_tile
    while Bt > 8 and 2 * _blk_bytes(Bt) > 24 * 1024 * 1024:
        Bt = max(8, ((Bt // 2) // 8) * 8)

    Bp = pl.cdiv(B, Bt) * Bt
    if Bp != B:
        pad = Bp - B
        Q = jnp.pad(Q, ((0, pad), (0, 0)))
        Kt = jnp.pad(Kt, ((0, pad), (0, 0), (0, 0)))
        Vt = jnp.pad(Vt, ((0, pad), (0, 0), (0, 0)))
        mask = jnp.pad(mask, ((0, pad), (0, 0)))

    vmem_limit = int(min(64 * 1024 * 1024,
                         max(32 * 1024 * 1024, 4 * _blk_bytes(Bt))))

    kernel = functools.partial(_dot_product_attention_kernel, scale=scale)

    out = pl.pallas_call(
        kernel,
        out_shape=jax.ShapeDtypeStruct((Bp, Dv), Q.dtype),
        grid_spec=pltpu.PrefetchScalarGridSpec(
            num_scalar_prefetch=0,
            grid=(Bp // Bt,),
            in_specs=[
                pl.BlockSpec((Bt, Dk), lambda i: (i, 0)),        # Q
                pl.BlockSpec((Bt, P, Dk), lambda i: (i, 0, 0)),  # K^T
                pl.BlockSpec((Bt, P, Dv), lambda i: (i, 0, 0)),  # V^T
                pl.BlockSpec((Bt, P), lambda i: (i, 0)),         # mask
            ],
            out_specs=pl.BlockSpec((Bt, Dv), lambda i: (i, 0)),  # lane-dense slab
        ),
        compiler_params=pltpu.CompilerParams(
            dimension_semantics=("parallel",),
            vmem_limit_bytes=vmem_limit),
    )(Q, Kt, Vt, mask)

    return out[:B]


def _reference(Q, K, V, mask=None):
    # Pure-JAX reference mirroring the PyTorch forward exactly.
    Dk = Q.shape[1]
    scale = 1.0 / (Dk ** 0.5)
    energy = jnp.einsum('bd,bdp->bp', Q, K)[:, None, :]            # [B,1,P]
    if mask is not None:
        energy = energy * mask[:, None, :].astype(energy.dtype)
    attn = jax.nn.softmax(energy * scale, axis=2)                  # [B,1,P]
    out = jnp.einsum('bqp,bpv->bqv', attn, jnp.transpose(V, (0, 2, 1)))
    return out[:, 0, :]                                            # [B,Dv]


if __name__ == "__main__":
    key = jax.random.PRNGKey(0)
    kq, kk, kv, km = jax.random.split(key, 4)

    B, Dk, Dv, P = 2, 32, 32, 8
    Q = jax.random.normal(kq, (B, Dk), dtype=jnp.float32)
    K = jax.random.normal(kk, (B, Dk, P), dtype=jnp.float32)
    V = jax.random.normal(kv, (B, Dv, P), dtype=jnp.float32)
    mask = (jax.random.uniform(km, (B, P)) > 0.3).astype(jnp.float32)

    out = dot_product_attention(Q, K, V, mask)
    out = jax.block_until_ready(out)

    ref = _reference(Q, K, V, mask)
    assert out.shape == (B, Dv), out.shape
    # approx=True reciprocal in the softmax denom -> allow ~1e-3 relative slack.
    assert jnp.allclose(out, ref, rtol=2e-3, atol=2e-3), (
        float(jnp.max(jnp.abs(out - ref))))

    print("KERNEL_OK")
</pallas_src>

<mosaic_0001>
module attributes {stable_mosaic.version = 11 : i64} {
  func.func @_dot_product_attention_kernel(%arg0: i32, %arg1: memref<2x32xf32, #tpu.memory_space<vmem>>, %arg2: memref<2x8x32xf32, #tpu.memory_space<vmem>>, %arg3: memref<2x8x32xf32, #tpu.memory_space<vmem>>, %arg4: memref<2x8xf32, #tpu.memory_space<vmem>>, %arg5: memref<2x32xf32, #tpu.memory_space<vmem>>) attributes {dimension_semantics = [#tpu.dimension_semantics<parallel>], iteration_bounds = array<i64: 1>, scalar_prefetch = 0 : i64, scratch_operands = 0 : i64, tpu.core_type = #tpu.core_type<tc>, window_params = [{transform_indices = @transform_0, window_bounds = array<i64: 2, 32>}, {transform_indices = @transform_1, window_bounds = array<i64: 2, 8, 32>}, {transform_indices = @transform_2, window_bounds = array<i64: 2, 8, 32>}, {transform_indices = @transform_3, window_bounds = array<i64: 2, 8>}, {transform_indices = @transform_4, window_bounds = array<i64: 2, 32>}]} {
    %c0 = arith.constant 0 : index
    %c0_0 = arith.constant 0 : index
    %0 = vector.load %arg1[%c0, %c0_0] : memref<2x32xf32, #tpu.memory_space<vmem>>, vector<2x32xf32>
    %c0_1 = arith.constant 0 : index
    %c0_2 = arith.constant 0 : index
    %c0_3 = arith.constant 0 : index
    %1 = vector.load %arg2[%c0_1, %c0_2, %c0_3] : memref<2x8x32xf32, #tpu.memory_space<vmem>>, vector<2x8x32xf32>
    %c0_4 = arith.constant 0 : index
    %c0_5 = arith.constant 0 : index
    %2 = vector.load %arg4[%c0_4, %c0_5] : memref<2x8xf32, #tpu.memory_space<vmem>>, vector<2x8xf32>
    %3 = vector.shape_cast %0 : vector<2x32xf32> to vector<2x1x32xf32>
    %4 = vector.broadcast %3 : vector<2x1x32xf32> to vector<2x8x32xf32>
    %5 = arith.mulf %4, %1 : vector<2x8x32xf32>
    %cst = arith.constant dense<0.000000e+00> : vector<2x8xf32>
    %6 = vector.multi_reduction <add>, %5, %cst [2] : vector<2x8x32xf32> to vector<2x8xf32>
    %7 = arith.mulf %6, %2 : vector<2x8xf32>
    %cst_6 = arith.constant 0.176776692 : f32
    %8 = vector.broadcast %cst_6 : f32 to vector<2x8xf32>
    %9 = arith.mulf %7, %8 : vector<2x8xf32>
    %cst_7 = arith.constant dense<0xFF800000> : vector<2xf32>
    %10 = vector.multi_reduction <maximumf>, %9, %cst_7 [1] : vector<2x8xf32> to vector<2xf32>
    %11 = vector.shape_cast %10 : vector<2xf32> to vector<2x1xf32>
    %12 = vector.broadcast %11 : vector<2x1xf32> to vector<2x8xf32>
    %13 = arith.subf %9, %12 : vector<2x8xf32>
    %14 = math.exp %13 : vector<2x8xf32>
    %cst_8 = arith.constant dense<0.000000e+00> : vector<2xf32>
    %15 = vector.multi_reduction <add>, %14, %cst_8 [1] : vector<2x8xf32> to vector<2xf32>
    %16 = vector.shape_cast %15 : vector<2xf32> to vector<2x1xf32>
    %17 = tpu.reciprocal %16 {approx = true} : vector<2x1xf32> -> vector<2x1xf32>
    %18 = vector.broadcast %17 : vector<2x1xf32> to vector<2x8xf32>
    %19 = arith.mulf %14, %18 : vector<2x8xf32>
    %c0_9 = arith.constant 0 : index
    %c0_10 = arith.constant 0 : index
    %c0_11 = arith.constant 0 : index
    %20 = vector.load %arg3[%c0_9, %c0_10, %c0_11] : memref<2x8x32xf32, #tpu.memory_space<vmem>>, vector<2x8x32xf32>
    %21 = vector.shape_cast %19 : vector<2x8xf32> to vector<2x8x1xf32>
    %22 = vector.broadcast %21 : vector<2x8x1xf32> to vector<2x8x32xf32>
    %23 = arith.mulf %22, %20 : vector<2x8x32xf32>
    %cst_12 = arith.constant dense<0.000000e+00> : vector<2x32xf32>
    %24 = vector.multi_reduction <add>, %23, %cst_12 [1] : vector<2x8x32xf32> to vector<2x32xf32>
    %c0_13 = arith.constant 0 : index
    %c0_14 = arith.constant 0 : index
    %25 = vector.load %arg5[%c0_13, %c0_14] : memref<2x32xf32, #tpu.memory_space<vmem>>, vector<2x32xf32>
    tpu.vector_store %arg5[%c0_13, %c0_14], %24 {strides = array<i32>} : memref<2x32xf32, #tpu.memory_space<vmem>>, vector<2x32xf32>,
    return
  }
  func.func @transform_0(%arg0: i32) -> (i32, i32) {
    %c0_i32 = arith.constant 0 : i32
    %c0_i32_0 = arith.constant 0 : i32
    return %arg0, %c0_i32 : i32, i32
  }
  func.func @transform_1(%arg0: i32) -> (i32, i32, i32) {
    %c0_i32 = arith.constant 0 : i32
    %c0_i32_0 = arith.constant 0 : i32
    %c0_i32_1 = arith.constant 0 : i32
    return %arg0, %c0_i32, %c0_i32_0 : i32, i32, i32
  }
  func.func @transform_2(%arg0: i32) -> (i32, i32, i32) {
    %c0_i32 = arith.constant 0 : i32
    %c0_i32_0 = arith.constant 0 : i32
    %c0_i32_1 = arith.constant 0 : i32
    return %arg0, %c0_i32, %c0_i32_0 : i32, i32, i32
  }
  func.func @transform_3(%arg0: i32) -> (i32, i32) {
    %c0_i32 = arith.constant 0 : i32
    %c0_i32_0 = arith.constant 0 : i32
    return %arg0, %c0_i32 : i32, i32
  }
  func.func @transform_4(%arg0: i32) -> (i32, i32) {
    %c0_i32 = arith.constant 0 : i32
    %c0_i32_0 = arith.constant 0 : i32
    return %arg0, %c0_i32 : i32, i32
  }
}

</mosaic_0001>

<bundles_post_ra>
// kernel: tpu_custom_call.1
= control target key start
LH: loop header
LB: loop body
LE: loop exit
PB: predicated region body
PF: predicated region fallthrough
CT: control target
= control target key end

     0   :  { %9 = vsyncpa [#allocation3], 0  ;;  %s423_s0 = inlined_call_operand.hbm [shape: f32[2,32], index: 0, kind: input, shape index: {}]   ;;  %s424_s1 = inlined_call_operand.hbm [shape: f32[2,8,32], index: 1, kind: input, shape index: {}]   ;;  %s425_s2 = inlined_call_operand.hbm [shape: f32[2,8,32], index: 2, kind: input, shape index: {}]   ;;  %s426_s3 = inlined_call_operand.vmem [shape: f32[2,8], index: 3, kind: input, shape index: {}]   ;;  %s427_s4 = inlined_call_operand.hbm [shape: f32[2,32], index: 4, kind: output, shape index: {}]  }
   0x1   :  { %10 = vsyncpa [#allocation6], 0 }
   0x2   :  { %11 = vsyncpa [#allocation4], 0  ;;  %s354_s15 = smov [#allocation5]  }
   0x3   :  { %s27_s16 = sshll.u32 %s354_s15, 4  ;;  %s28_s16 = int_to_ptr.vmem [resolvable:$true] %s27_s16 }
   0x4   :  { %s276_s17 = scalar_lea.vmem %s28_s16, 256  ;;  %p281_p1 = scmp.lt.s32.totalorder %s28_s16, %s28_s16 }
   0x5   :  { %p277_p0 = scmp.ne.s32.totalorder %s28_s16, %s276_s17  ;;  %p282_p2 = scmp.lt.s32.totalorder %s276_s17, %s276_s17 }
   0x7   :  { %p283_p3 = por %p282_p2, %p281_p1 }
   0x9   :  { %p284_p4 = pnand %p283_p3, %p277_p0 }
   0xb   :  { %287 = shalt.err (!%p284_p4)
}
   0xc   :  { %s355_s18 = smov 128   ;;  %s356_s19 = smov 8  }
   0xd   :  { %33 = dma.hbm_to_vmem [thread:$0]  %s424_s1, 256, %s28_s16, [#allocation6], %s355_s18, %s355_s18, %s356_s19  }
   0xe   :  { %s357_s22 = smov [#allocation2]   ;;  %s358_s24 = smov [#allocation7]  }
   0xf   :  { %s18_s23 = sshll.u32 %s357_s22, 4  ;;  %s39_s25 = sshll.u32 %s358_s24, 4  ;;  %s19_s23 = int_to_ptr.vmem [resolvable:$true] %s18_s23  ;;  %s40_s25 = int_to_ptr.vmem [resolvable:$true] %s39_s25 }
  0x10   :  { %s296_s26 = scalar_lea.vmem %s19_s23, 32  ;;  %p301_p6 = scmp.lt.s32.totalorder %s19_s23, %s19_s23 }
  0x11   :  { %p297_p5 = scmp.ne.s32.totalorder %s19_s23, %s296_s26  ;;  %p302_p7 = scmp.lt.s32.totalorder %s296_s26, %s296_s26 }
  0x13   :  { %p303_p8 = por %p302_p7, %p301_p6 }
  0x15   :  { %p304_p9 = pnand %p303_p8, %p297_p5 }
  0x17   :  { %307 = shalt.err (!%p304_p9)
}
  0x18   :  { %21 = dma.hbm_to_vmem [thread:$0]  %s423_s0, 32, %s19_s23, [#allocation3]  }
  0x19   :  { %s316_s29 = scalar_lea.vmem %s40_s25, 256  ;;  %p321_p11 = scmp.lt.s32.totalorder %s40_s25, %s40_s25 }
  0x1a   :  { %p317_p10 = scmp.ne.s32.totalorder %s40_s25, %s316_s29  ;;  %p322_p12 = scmp.lt.s32.totalorder %s316_s29, %s316_s29 }
  0x1c   :  { %p323_p13 = por %p322_p12, %p321_p11 }
  0x1e   :  { %p324_p0 = pnand %p323_p13, %p317_p10 }
  0x20   :  { %327 = shalt.err (!%p324_p0)
}
  0x21   :  { %45 = dma.hbm_to_vmem [thread:$0]  %s425_s2, 256, %s40_s25, [#allocation6], %s355_s18, %s355_s18, %s356_s19  }
  0x22   :  { %348 = dma.done.wait [#allocation3], 32  }
  0x23   :  { %349 = vsyncadd [#allocation3], 4294967264 }
  0x24   :  { %350 = dma.done.wait [#allocation6], 512  }
  0x25   :  { %351 = vsyncadd [#allocation6], 4294966784  ;;  %v73_v0 = vlaneseq  ;;  %v359_v1 = vmov 1966171168   ;;  %v60_v11 = vld [vmem:[%s426_s3] sm:$0x3] }
  0x26   :  { %v71_v2 = vunpack.c.l.s4 %v359_v1  ;;  %v251_v7 = vld.sshfl [vmem:[#allocation2] sm:$0x11 pattern:$0x75316420]  ;;  %v58_v12 = vld [vmem:[#allocation5] sm:$0xff]  ;;  %vm96_vm0 = vcmask 261120  }
  0x27   :  { %v74_v3 = vshrl.u32 %v73_v0, 7  ;;  %v69_v10 = vcombine.high %v251_v7, %v251_v7  ;;  %v59_v16 = vld [vmem:[#allocation5 + $0x8] sm:$0xff]  ;;  %v360_v23 = vmov 0   ;;  %v133_v24 = vand.u32 127, %v73_v0  ;;  %v201_v61 = vld [vmem:[#allocation7] sm:$0xff]  ;;  %v202_v0 = vld [vmem:[#allocation7 + $0x8] sm:$0xff] }
  0x28   :  { %v72_v4 = vunpack.c.0.s8 %v71_v2  ;;  %260 = vset.pattern.permute.xlu0 %v360_v23  ;;  %261 = vset.pattern.permute.xlu1 %v360_v23  ;;  %vm142_vm1 = vcmask 1041409   ;;  %vm145_vm2 = vcmask 58368   ;;  %s361_s2 = smov [#allocation8]   ;;  %vm233_vm3 = vcmask 254976  }
  0x29   :  { %v396_v6 = vsub.s32 0, %v74_v3  ;;  %v398_v8 = vsub.s32 1, %v74_v3  ;;  %v136_v25 = vsub.s32 %v133_v24, %v74_v3  ;;  %s241_s3 = sshll.u32 %s361_s2, 4  ;;  %s242_s3 = int_to_ptr.vmem [resolvable:$true] %s241_s3 }
  0x2a   :  { %v75_v5 = vsub.s32 %v72_v4, %v74_v3  ;;  %s328_s6 = scalar_lea.vmem %s242_s3, 32  ;;  %p333_p2 = scmp.lt.s32.totalorder %s242_s3, %s242_s3 }
  0x2b   :  { %v107_v13 = vrot.slane %v60_v11, %v396_v6  ;;  %v114_v17 = vrot.slane %v60_v11, %v398_v8  ;;  %p329_p1 = scmp.ne.s32.totalorder %s242_s3, %s328_s6  ;;  %p334_p3 = scmp.lt.s32.totalorder %s328_s6, %s328_s6 }
  0x2c   :  { %v76_v9 = vrot.slane %v251_v7, %v75_v5  ;;  %v83_v15 = vrot.slane %v69_v10, %v75_v5 }
  0x2d   :  { %109 = vbcast.lane.b32.xlu1 %v107_v13, 256  ;;  %p335_p4 = por %p334_p3, %p333_p2 }
  0x2e   :  { %v87_v14 = vrot.slane %v76_v9, %v396_v6  ;;  %v91_v19 = vrot.slane %v83_v15, %v396_v6 }
  0x2f   :  { %p336_p5 = pnand %p335_p4, %p329_p1 }
  0x30   :  { %v94_v18 = vmul.f32 %v87_v14, %v58_v12  ;;  %v95_v21 = vmul.f32 %v91_v19, %v59_v16 }
  0x31   :  { %116 = vbcast.lane.b32.xlu1 %v114_v17, 256 }
  0x32   :  { %v97_v20 = vsel %vm96_vm0, %v94_v18, 0.0  ;;  %v100_v22 = vsel %vm96_vm0, %v95_v21, 0.0 }
  0x33   :  { %98 = vadd.xlane.f32.xlu0 %v97_v20 }
  0x37   :  { %101 = vadd.xlane.f32.xlu0 %v100_v22 }
  0x9f   :  { %v110_v26 = vpop.permute.xlu1 %109 }
  0xa3   :  { %v117_v29 = vpop.permute.xlu1 %116 }
  0xbc   :  { %v99_v27 = vpop.xlane.xlu0 %98 }
  0xbd   :  { %v120_v28 = vmul.f32 %v110_v26, %v99_v27 }
  0xbf   :  { %v122_v30 = vmul.f32 0.17677669, %v120_v28 }
  0xc0   :  { %v102_v31 = vpop.xlane.xlu0 %101 }
  0xc1   :  { %v121_v32 = vmul.f32 %v117_v29, %v102_v31  ;;  %127 = vperm.xlu0 %260, %v122_v30  }
  0xc3   :  { %v123_v33 = vmul.f32 0.17677669, %v121_v32 }
  0xc5   :  { %130 = vperm.xlu1 %261, %v123_v33  }
 0x13c   :  { %v128_v34 = vpop.permute.xlu0 %127 }
 0x13d   :  { %v137_v36 = vrot.slane %v128_v34, %v136_v25 }
 0x140   :  { %v131_v35 = vpop.permute.xlu1 %130 }
 0x141   :  { %v141_v37 = vrot.slane %v131_v35, %v136_v25 }
 0x143   :  { %v143_v38 = vsel %vm142_vm1, %v141_v37, %v137_v36 }
 0x144   :  { %v146_v39 = vsel %vm145_vm2, %v143_v38, -inf }
 0x145   :  { %147 = vmax.xlane.f32.xlu1 %v146_v39 }
 0x1ce   :  { %v148_v40 = vpop.xlane.xlu1 %147 }
 0x1cf   :  { %v153_v41 = vrot.slane %v148_v40, %v396_v6  ;;  %v157_v42 = vrot.slane %v148_v40, %v398_v8 }
 0x1d1   :  { %v160_v43 = vsub.f32 %v122_v30, %v153_v41  ;;  %v161_v44 = vsub.f32 %v123_v33, %v157_v42 }
 0x1d3   :  { %v162_v45 = vmul.f32 1.442695, %v160_v43  ;;  %v164_v46 = vmul.f32 1.442695, %v161_v44 }
 0x1d5   :  { %262 = vpow2.f32 %v162_v45 }
 0x1d6   :  { %264 = vpow2.f32 %v164_v46 }
 0x1e2   :  { %v263_v47 = vpop.eup %262 }
 0x1e3   :  { %v265_v48 = vpop.eup %264  ;;  %169 = vperm.xlu1 %261, %v263_v47  }
 0x1e4   :  { %172 = vperm.xlu0 %260, %v265_v48  }
 0x25e   :  { %v170_v49 = vpop.permute.xlu1 %169 }
 0x25f   :  { %v173_v50 = vpop.permute.xlu0 %172  ;;  %v177_v51 = vrot.slane %v170_v49, %v136_v25 }
 0x260   :  { %v181_v52 = vrot.slane %v173_v50, %v136_v25 }
 0x262   :  { %v182_v53 = vsel %vm142_vm1, %v181_v52, %v177_v51 }
 0x263   :  { %v184_v54 = vsel %vm145_vm2, %v182_v53, 0.0 }
 0x264   :  { %185 = vadd.xlane.f32.xlu0 %v184_v54 }
 0x2ed   :  { %v186_v55 = vpop.xlane.xlu0 %185 }
 0x2ee   :  { %266 = vrcp.f32 %v186_v55 }
 0x2fb   :  { %v267_v56 = vpop.eup %266 }
 0x2fc   :  { %v192_v57 = vrot.slane %v267_v56, %v396_v6  ;;  %v196_v59 = vrot.slane %v267_v56, %v398_v8 }
 0x2fe   :  { %v199_v58 = vmul.f32 %v263_v47, %v192_v57  ;;  %v200_v60 = vmul.f32 %v265_v48, %v196_v59 }
 0x300   :  { %205 = vperm.xlu1 %261, %v199_v58  }
 0x304   :  { %210 = vperm.xlu1 %261, %v200_v60  }
 0x37b   :  { %v206_v62 = vpop.permute.xlu1 %205 }
 0x37c   :  { %v213_v63 = vmul.f32 %v206_v62, %v201_v61 }
 0x37e   :  { %v215_v1 = vsel %vm96_vm0, %v213_v63, 0.0 }
 0x37f   :  { %v216_v2 = vrot.slane %v215_v1, 4  ;;  %v211_v3 = vpop.permute.xlu1 %210 }
 0x380   :  { %v214_v4 = vmul.f32 %v211_v3, %v202_v0 }
 0x381   :  { %v217_v5 = vadd.f32 %v216_v2, %v215_v1 }
 0x382   :  { %v222_v7 = vsel %vm96_vm0, %v214_v4, 0.0 }
 0x383   :  { %v218_v9 = vrot.slane %v217_v5, 2  ;;  %v223_v6 = vrot.slane %v222_v7, 4 }
 0x385   :  { %v219_v10 = vadd.f32 %v218_v9, %v217_v5  ;;  %v224_v11 = vadd.f32 %v223_v6, %v222_v7 }
 0x387   :  { %v225_v8 = vrot.slane %v224_v11, 2  ;;  %v220_v12 = vrot.slane %v219_v10, 1 }
 0x389   :  { %v226_v13 = vadd.f32 %v225_v8, %v224_v11  ;;  %v221_v15 = vadd.f32 %v220_v12, %v219_v10 }
 0x38b   :  { %v227_v14 = vrot.slane %v226_v13, 1 }
 0x38d   :  { %v228_v16 = vadd.f32 %v227_v14, %v226_v13 }
 0x38f   :  { %v231_v17 = vsel %vm142_vm1, %v228_v16, %v221_v15 }
 0x390   :  { %234 = vst.msk [vmem:[#allocation8] sm:$0x3] %vm233_vm3, %v231_v17 }
 0x391   :  { %339 = shalt.err (!%p336_p5)
}
 0x392   :  { %244 = dma.vmem_to_hbm [thread:$0]  %s242_s3, 32, %s427_s4, [#allocation4]  }
 0x393   :  { %352 = dma.done.wait [#allocation4], 32  }
 0x394   :  { %353 = vsyncadd [#allocation4], 4294967264 }
 0x395   :  { %248 = vsyncpa [#allocation3], 1 }
 0x396   :  { %249 = vsyncpa [#allocation6], 1 }
 0x397   :  { %250 = vsyncpa [#allocation4], 1 }

</bundles_post_ra>
